<compile_context>
chip_gen: v6e
topology: v6e:2x2x1
jax: 0.10.0
libtpu: 0.0.40
codegen_flags: <defaults>
</compile_context>

<pallas_src>
import functools
import math

import jax
import jax.numpy as jnp
from jax.experimental import pallas as pl
from jax.experimental.pallas import tpu as pltpu


def _round_up(x: int, m: int) -> int:
    return ((x + m - 1) // m) * m


def _base_attention_kernel(ctxt_ref, kproj_ref, out_ref, m_sc, l_sc, acc_sc, *,
                           seq_len):
    """One (batch block, seq block) grid step of flash-style attention.

    Kernel ref shapes:
      ctxt_ref : (B_blk, S_blk, Din)  bf16
      kproj_ref: (B_blk, Din)         f32   (scaled key projection)
      out_ref  : (B_blk, Din)         f32   (normalized weighted context)
      scratch  : m (B_blk,1), l (B_blk,1), acc (B_blk,Din)  all f32
    """
    s_idx = pl.program_id(1)
    s_blk = ctxt_ref.shape[1]

    @pl.when(s_idx == 0)
    def _init():
        m_sc[...] = jnp.full_like(m_sc, -jnp.inf)
        l_sc[...] = jnp.zeros_like(l_sc)
        acc_sc[...] = jnp.zeros_like(acc_sc)

    # Single f32 copy of the streamed bf16 tile; reused by both reductions.
    ctxt = ctxt_ref[...].astype(jnp.float32)          # (B_blk, S_blk, Din)
    kproj = kproj_ref[...]                            # (B_blk, Din) f32

    # Scores on the VPU + XLU lane-reduce (mem-bound kernel; avoids B_blk
    # independent M=1 MXU pushes).
    scores = jnp.sum(kproj[:, None, :] * ctxt, axis=-1)          # (B_blk, S_blk)

    if seq_len is not None:  # only traced when S was padded to a multiple of S_blk
        pos = s_idx * s_blk + jax.lax.broadcasted_iota(jnp.int32, scores.shape, 1)
        scores = jnp.where(pos < seq_len, scores, -jnp.inf)

    # Online (flash) softmax update.
    m_prev = m_sc[...]                                            # (B_blk, 1)
    m_new = jnp.maximum(m_prev, jnp.max(scores, axis=-1, keepdims=True))
    alpha = jnp.exp(m_prev - m_new)                               # exp(-inf)=0 at s==0
    p = jnp.exp(scores - m_new)                                   # (B_blk, S_blk)

    l_sc[...] = alpha * l_sc[...] + jnp.sum(p, axis=-1, keepdims=True)
    # Weighted context: broadcast-multiply + sublane (seq) reduce on the XLU.
    acc_sc[...] = alpha * acc_sc[...] + jnp.sum(p[:, :, None] * ctxt, axis=1)
    m_sc[...] = m_new

    @pl.when(s_idx == pl.num_programs(1) - 1)
    def _finalize():
        out_ref[...] = (acc_sc[...] / l_sc[...]).astype(out_ref.dtype)


def base_attention_forward(ctxt, key, w_proj, w_out, *, s_blk=None, b_blk=None):
    """ctxt: (B, S, Din) f32, key: (B, Dk) f32, w_proj: (Din, Dk), w_out: (Din, Dout).
    Returns the attended + projected output (B, Dout) in f32."""
    B, S, Din = ctxt.shape
    Dk = w_proj.shape[1]
    Dout = w_out.shape[1]
    assert key.shape == (B, Dk) and w_out.shape[0] == Din

    f32 = jnp.float32
    scale = 1.0 / math.sqrt(Dk)

    # Hoisted key projection: one well-shaped (B, Dk)@(Dk, Din) XLA matmul, kept f32.
    kproj = (key.astype(f32) @ w_proj.astype(f32).T) * scale       # (B, Din)

    # ---- block-size selection (multiples of 8; pad instead of full-S fallback) ----
    if b_blk is None:
        b_blk = min(_round_up(B, 8), 64)
    else:
        b_blk = min(_round_up(b_blk, 8), _round_up(B, 8))
    B_pad = _round_up(B, b_blk)
    n_b = B_pad // b_blk

    if s_blk is None:
        # ~4 MiB bf16 ctxt tile per pipeline buffer: big enough to amortize the
        # ~0.35us per-step overhead, small enough (with f32 intermediates) to stay
        # well under the 48 MiB VMEM cap on every generation.
        per_row_bytes = max(1, b_blk * Din * 2)
        s_blk = max(8, ((4 << 20) // per_row_bytes) // 8 * 8)
    else:
        s_blk = max(8, _round_up(s_blk, 8))
    s_blk = min(s_blk, _round_up(S, 8))
    S_pad = _round_up(S, s_blk)
    n_s = S_pad // s_blk

    # ---- pad + cast inputs ----
    ctxt_c = ctxt.astype(jnp.bfloat16)
    if B_pad != B or S_pad != S:
        ctxt_c = jnp.pad(ctxt_c, ((0, B_pad - B), (0, S_pad - S), (0, 0)))
    kproj_p = jnp.pad(kproj, ((0, B_pad - B), (0, 0))) if B_pad != B else kproj

    # ---- VMEM limit: safe on v7x (64 MiB/TC), generous on v5e/v6e ----
    try:
        vmem_cap = int(pltpu.get_tpu_info().vmem_capacity_bytes)
    except Exception:
        vmem_cap = 64 << 20
    vmem_limit = max(16 << 20, min(48 << 20, (vmem_cap * 3) // 4))

    cost = pl.CostEstimate(
        flops=int(4 * B_pad * S_pad * Din),
        transcendentals=int(B_pad * (S_pad + 2 * n_s)),
        bytes_accessed=int(B_pad * S_pad * Din * 2
                           + n_s * B_pad * Din * 4
                           + B_pad * Din * 4),
    )

    kernel = functools.partial(_base_attention_kernel,
                               seq_len=(S if S_pad != S else None))

    weighted_pad = pl.pallas_call(
        kernel,
        out_shape=jax.ShapeDtypeStruct((B_pad, Din), jnp.float32),
        grid_spec=pltpu.PrefetchScalarGridSpec(
            num_scalar_prefetch=0,
            grid=(n_b, n_s),                 # batch parallel, seq reduction last
            in_specs=[
                pl.BlockSpec((b_blk, s_blk, Din), lambda b, s: (b, s, 0)),
                pl.BlockSpec((b_blk, Din), lambda b, s: (b, 0)),
            ],
            out_specs=pl.BlockSpec((b_blk, Din), lambda b, s: (b, 0)),
            scratch_shapes=[
                pltpu.VMEM((b_blk, 1), jnp.float32),    # running max m
                pltpu.VMEM((b_blk, 1), jnp.float32),    # running sum l
                pltpu.VMEM((b_blk, Din), jnp.float32),  # weighted-context acc
            ],
        ),
        compiler_params=pltpu.CompilerParams(
            dimension_semantics=("parallel", "arbitrary"),
            vmem_limit_bytes=vmem_limit),
        cost_estimate=cost,
    )(ctxt_c, kproj_p)

    # Hoisted output projection: one (B, Din)@(Din, Dout) XLA matmul in f32.
    weighted = weighted_pad[:B]
    return weighted @ w_out.astype(f32)


if __name__ == "__main__":
    # Small shapes implied by the module's __init__ signature.
    input_emb_size = 32
    key_emb_size = 16
    output_emb_size = 32
    B, S = 2, 8

    k0, k1, k2, k3 = jax.random.split(jax.random.PRNGKey(0), 4)
    ctxt = jax.random.normal(k0, (B, S, input_emb_size), dtype=jnp.float32)
    key = jax.random.normal(k1, (B, key_emb_size), dtype=jnp.float32)
    w_proj = jax.random.normal(k2, (input_emb_size, key_emb_size),
                               dtype=jnp.float32) / math.sqrt(input_emb_size)
    w_out = jax.random.normal(k3, (input_emb_size, output_emb_size),
                              dtype=jnp.float32) / math.sqrt(input_emb_size)

    out = base_attention_forward(ctxt, key, w_proj, w_out)
    jax.block_until_ready(out)
    assert out.shape == (B, output_emb_size), out.shape

    # Pure-JAX f32 reference of the same math (tolerance covers bf16 ctxt streaming).
    scores_ref = jnp.einsum('bsd,dk,bk->bs', ctxt, w_proj, key) / math.sqrt(key_emb_size)
    attn_ref = jax.nn.softmax(scores_ref, axis=-1)
    ref = jnp.einsum('bs,bsd->bd', attn_ref, ctxt) @ w_out
    max_err = float(jnp.max(jnp.abs(out - ref)))
    assert max_err < 1e-1, f"max abs err vs reference: {max_err}"

    print("KERNEL_OK")
</pallas_src>

<mosaic_0001>
module attributes {stable_mosaic.version = 11 : i64} {
  func.func @_base_attention_kernel(%arg0: i32, %arg1: i32, %arg2: memref<8x8x32xbf16, #tpu.memory_space<vmem>>, %arg3: memref<8x32xf32, #tpu.memory_space<vmem>>, %arg4: memref<8x32xf32, #tpu.memory_space<vmem>>, %arg5: memref<8x1xf32, #tpu.memory_space<vmem>>, %arg6: memref<8x1xf32, #tpu.memory_space<vmem>>, %arg7: memref<8x32xf32, #tpu.memory_space<vmem>>) attributes {dimension_semantics = [#tpu.dimension_semantics<parallel>, #tpu.dimension_semantics<arbitrary>], iteration_bounds = array<i64: 1, 1>, scalar_prefetch = 0 : i64, scratch_operands = 3 : i64, tpu.core_type = #tpu.core_type<tc>, window_params = [{transform_indices = @transform_0, window_bounds = array<i64: 8, 8, 32>}, {transform_indices = @transform_1, window_bounds = array<i64: 8, 32>}, {transform_indices = @transform_2, window_bounds = array<i64: 8, 32>}]} {
    %c0_i32 = arith.constant 0 : i32
    %0 = arith.cmpi eq, %arg1, %c0_i32 : i32
    %1 = arith.extui %0 : i1 to i32
    %c0_i32_0 = arith.constant 0 : i32
    %2 = arith.cmpi ne, %1, %c0_i32_0 : i32
    scf.if %2 {
      %cst_22 = arith.constant 0xFF800000 : f32
      %38 = vector.broadcast %cst_22 : f32 to vector<8x1xf32>
      %c0_23 = arith.constant 0 : index
      %c0_24 = arith.constant 0 : index
      %39 = vector.load %arg5[%c0_23, %c0_24] : memref<8x1xf32, #tpu.memory_space<vmem>>, vector<8x1xf32>
      tpu.vector_store %arg5[%c0_23, %c0_24], %38 {strides = array<i32>} : memref<8x1xf32, #tpu.memory_space<vmem>>, vector<8x1xf32>,
      %cst_25 = arith.constant 0.000000e+00 : f32
      %40 = vector.broadcast %cst_25 : f32 to vector<8x1xf32>
      %c0_26 = arith.constant 0 : index
      %c0_27 = arith.constant 0 : index
      %41 = vector.load %arg6[%c0_26, %c0_27] : memref<8x1xf32, #tpu.memory_space<vmem>>, vector<8x1xf32>
      tpu.vector_store %arg6[%c0_26, %c0_27], %40 {strides = array<i32>} : memref<8x1xf32, #tpu.memory_space<vmem>>, vector<8x1xf32>,
      %cst_28 = arith.constant 0.000000e+00 : f32
      %42 = vector.broadcast %cst_28 : f32 to vector<8x32xf32>
      %c0_29 = arith.constant 0 : index
      %c0_30 = arith.constant 0 : index
      %43 = vector.load %arg7[%c0_29, %c0_30] : memref<8x32xf32, #tpu.memory_space<vmem>>, vector<8x32xf32>
      tpu.vector_store %arg7[%c0_29, %c0_30], %42 {strides = array<i32>} : memref<8x32xf32, #tpu.memory_space<vmem>>, vector<8x32xf32>,
    } else {
    }
    %c0 = arith.constant 0 : index
    %c0_1 = arith.constant 0 : index
    %c0_2 = arith.constant 0 : index
    %3 = vector.load %arg2[%c0, %c0_1, %c0_2] : memref<8x8x32xbf16, #tpu.memory_space<vmem>>, vector<8x8x32xbf16>
    %4 = arith.extf %3 : vector<8x8x32xbf16> to vector<8x8x32xf32>
    %c0_3 = arith.constant 0 : index
    %c0_4 = arith.constant 0 : index
    %5 = vector.load %arg3[%c0_3, %c0_4] : memref<8x32xf32, #tpu.memory_space<vmem>>, vector<8x32xf32>
    %6 = vector.shape_cast %5 : vector<8x32xf32> to vector<8x1x32xf32>
    %7 = vector.broadcast %6 : vector<8x1x32xf32> to vector<8x8x32xf32>
    %8 = arith.mulf %7, %4 : vector<8x8x32xf32>
    %cst = arith.constant dense<0.000000e+00> : vector<8x8xf32>
    %9 = vector.multi_reduction <add>, %8, %cst [2] : vector<8x8x32xf32> to vector<8x8xf32>
    %c0_5 = arith.constant 0 : index
    %c0_6 = arith.constant 0 : index
    %10 = vector.load %arg5[%c0_5, %c0_6] : memref<8x1xf32, #tpu.memory_space<vmem>>, vector<8x1xf32>
    %cst_7 = arith.constant dense<0xFF800000> : vector<8xf32>
    %11 = vector.multi_reduction <maximumf>, %9, %cst_7 [1] : vector<8x8xf32> to vector<8xf32>
    %12 = vector.shape_cast %11 : vector<8xf32> to vector<8x1xf32>
    %13 = arith.maximumf %10, %12 : vector<8x1xf32>
    %14 = arith.subf %10, %13 : vector<8x1xf32>
    %15 = math.exp %14 : vector<8x1xf32>
    %16 = vector.broadcast %13 : vector<8x1xf32> to vector<8x8xf32>
    %17 = arith.subf %9, %16 : vector<8x8xf32>
    %18 = math.exp %17 : vector<8x8xf32>
    %c0_8 = arith.constant 0 : index
    %c0_9 = arith.constant 0 : index
    %19 = vector.load %arg6[%c0_8, %c0_9] : memref<8x1xf32, #tpu.memory_space<vmem>>, vector<8x1xf32>
    %20 = arith.mulf %15, %19 : vector<8x1xf32>
    %cst_10 = arith.constant dense<0.000000e+00> : vector<8xf32>
    %21 = vector.multi_reduction <add>, %18, %cst_10 [1] : vector<8x8xf32> to vector<8xf32>
    %22 = vector.shape_cast %21 : vector<8xf32> to vector<8x1xf32>
    %23 = arith.addf %20, %22 : vector<8x1xf32>
    %c0_11 = arith.constant 0 : index
    %c0_12 = arith.constant 0 : index
    %24 = vector.load %arg6[%c0_11, %c0_12] : memref<8x1xf32, #tpu.memory_space<vmem>>, vector<8x1xf32>
    tpu.vector_store %arg6[%c0_11, %c0_12], %23 {strides = array<i32>} : memref<8x1xf32, #tpu.memory_space<vmem>>, vector<8x1xf32>,
    %c0_13 = arith.constant 0 : index
    %c0_14 = arith.constant 0 : index
    %25 = vector.load %arg7[%c0_13, %c0_14] : memref<8x32xf32, #tpu.memory_space<vmem>>, vector<8x32xf32>
    %26 = vector.broadcast %15 : vector<8x1xf32> to vector<8x32xf32>
    %27 = arith.mulf %26, %25 : vector<8x32xf32>
    %28 = vector.shape_cast %18 : vector<8x8xf32> to vector<8x8x1xf32>
    %29 = vector.broadcast %28 : vector<8x8x1xf32> to vector<8x8x32xf32>
    %30 = arith.mulf %29, %4 : vector<8x8x32xf32>
    %cst_15 = arith.constant dense<0.000000e+00> : vector<8x32xf32>
    %31 = vector.multi_reduction <add>, %30, %cst_15 [1] : vector<8x8x32xf32> to vector<8x32xf32>
    %32 = arith.addf %27, %31 : vector<8x32xf32>
    %c0_16 = arith.constant 0 : index
    %c0_17 = arith.constant 0 : index
    %33 = vector.load %arg7[%c0_16, %c0_17] : memref<8x32xf32, #tpu.memory_space<vmem>>, vector<8x32xf32>
    tpu.vector_store %arg7[%c0_16, %c0_17], %32 {strides = array<i32>} : memref<8x32xf32, #tpu.memory_space<vmem>>, vector<8x32xf32>,
    %c0_18 = arith.constant 0 : index
    %c0_19 = arith.constant 0 : index
    %34 = vector.load %arg5[%c0_18, %c0_19] : memref<8x1xf32, #tpu.memory_space<vmem>>, vector<8x1xf32>
    tpu.vector_store %arg5[%c0_18, %c0_19], %13 {strides = array<i32>} : memref<8x1xf32, #tpu.memory_space<vmem>>, vector<8x1xf32>,
    %c0_i32_20 = arith.constant 0 : i32
    %35 = arith.cmpi eq, %arg1, %c0_i32_20 : i32
    %36 = arith.extui %35 : i1 to i32
    %c0_i32_21 = arith.constant 0 : i32
    %37 = arith.cmpi ne, %36, %c0_i32_21 : i32
    scf.if %37 {
      %c0_22 = arith.constant 0 : index
      %c0_23 = arith.constant 0 : index
      %38 = vector.load %arg7[%c0_22, %c0_23] : memref<8x32xf32, #tpu.memory_space<vmem>>, vector<8x32xf32>
      %c0_24 = arith.constant 0 : index
      %c0_25 = arith.constant 0 : index
      %39 = vector.load %arg6[%c0_24, %c0_25] : memref<8x1xf32, #tpu.memory_space<vmem>>, vector<8x1xf32>
      %40 = vector.broadcast %39 : vector<8x1xf32> to vector<8x32xf32>
      %41 = arith.divf %38, %40 : vector<8x32xf32>
      %c0_26 = arith.constant 0 : index
      %c0_27 = arith.constant 0 : index
      %42 = vector.load %arg4[%c0_26, %c0_27] : memref<8x32xf32, #tpu.memory_space<vmem>>, vector<8x32xf32>
      tpu.vector_store %arg4[%c0_26, %c0_27], %41 {strides = array<i32>} : memref<8x32xf32, #tpu.memory_space<vmem>>, vector<8x32xf32>,
    } else {
    }
    return
  }
  func.func @transform_0(%arg0: i32, %arg1: i32) -> (i32, i32, i32) {
    %c0_i32 = arith.constant 0 : i32
    %c0_i32_0 = arith.constant 0 : i32
    return %arg0, %arg1, %c0_i32 : i32, i32, i32
  }
  func.func @transform_1(%arg0: i32, %arg1: i32) -> (i32, i32) {
    %c0_i32 = arith.constant 0 : i32
    %c0_i32_0 = arith.constant 0 : i32
    return %arg0, %c0_i32 : i32, i32
  }
  func.func @transform_2(%arg0: i32, %arg1: i32) -> (i32, i32) {
    %c0_i32 = arith.constant 0 : i32
    %c0_i32_0 = arith.constant 0 : i32
    return %arg0, %c0_i32 : i32, i32
  }
}

</mosaic_0001>

<bundles_post_ra>
// kernel: tpu_custom_call.1
= control target key start
LH: loop header
LB: loop body
LE: loop exit
PB: predicated region body
PF: predicated region fallthrough
CT: control target
= control target key end

     0   :  { %7 = vsyncpa [#allocation6], 0  ;;  %s839_s0 = inlined_call_operand.hbm [shape: bf16[8,8,32], index: 0, kind: input, shape index: {}]   ;;  %s840_s1 = inlined_call_operand.hbm [shape: f32[8,32], index: 1, kind: input, shape index: {}]   ;;  %s841_s2 = inlined_call_operand.hbm [shape: f32[8,32], index: 2, kind: output, shape index: {}]  }
   0x1   :  { %8 = vsyncpa [#allocation9], 0 }
   0x2   :  { %9 = vsyncpa [#allocation7], 0  ;;  %s645_s9 = smov [#allocation5]  }
   0x3   :  { %s15_s10 = sshll.u32 %s645_s9, 4  ;;  %s16_s10 = int_to_ptr.vmem [resolvable:$true] %s15_s10 }
   0x4   :  { %s587_s11 = scalar_lea.vmem %s16_s10, 512  ;;  %p592_p1 = scmp.lt.s32.totalorder %s16_s10, %s16_s10 }
   0x5   :  { %p588_p0 = scmp.ne.s32.totalorder %s16_s10, %s587_s11  ;;  %p593_p2 = scmp.lt.s32.totalorder %s587_s11, %s587_s11 }
   0x7   :  { %p594_p3 = por %p593_p2, %p592_p1 }
   0x9   :  { %p595_p4 = pnand %p594_p3, %p588_p0 }
   0xb   :  { %598 = shalt.err (!%p595_p4)
}
   0xc   :  { %s646_s12 = smov 64   ;;  %s647_s13 = smov 4  }
   0xd   :  { %21 = dma.hbm_to_vmem [thread:$0]  %s839_s0, 512, %s16_s10, [#allocation6], %s646_s12, %s646_s12, %s647_s13  }
   0xe   :  { %s648_s16 = smov [#allocation8]  }
   0xf   :  { %s28_s17 = sshll.u32 %s648_s16, 4  ;;  %s29_s17 = int_to_ptr.vmem [resolvable:$true] %s28_s17 }
  0x10   :  { %s607_s18 = scalar_lea.vmem %s29_s17, 128  ;;  %p612_p6 = scmp.lt.s32.totalorder %s29_s17, %s29_s17 }
  0x11   :  { %p608_p5 = scmp.ne.s32.totalorder %s29_s17, %s607_s18  ;;  %p613_p7 = scmp.lt.s32.totalorder %s607_s18, %s607_s18 }
  0x13   :  { %p614_p8 = por %p613_p7, %p612_p6 }
  0x15   :  { %p615_p9 = pnand %p614_p8, %p608_p5 }
  0x17   :  { %618 = shalt.err (!%p615_p9)
}
  0x18   :  { %31 = dma.hbm_to_vmem [thread:$0]  %s840_s1, 128, %s29_s17, [#allocation9]  }
  0x19   :  { %639 = dma.done.wait [#allocation6], 512  }
  0x1a   :  { %640 = vsyncadd [#allocation6], 4294966784 }
  0x1b   :  { %641 = dma.done.wait [#allocation9], 128  }
  0x1c   :  { %642 = vsyncadd [#allocation9], 4294967168  ;;  %v69_v0 = vlaneseq  ;;  %v649_v1 = vmov 1966171168   ;;  %v679_v6 = vld [vmem:[#allocation5] sm:$0xff]   ;;  %v684_v11 = vld [vmem:[#allocation5 + $0x8] sm:$0xff]  }
  0x1d   :  { %v67_v2 = vunpack.c.l.s4 %v649_v1  ;;  %v63_v7 = vld [vmem:[#allocation8] sm:$0xff]  ;;  %v530_v12 = vunpack.c.l.bf16 %v679_v6  ;;  %v687_v15 = vld [vmem:[#allocation5 + $0x10] sm:$0xff]   ;;  %v534_v17 = vunpack.c.l.bf16 %v684_v11  ;;  %v531_v18 = vunpack.c.h.bf16 %v679_v6  ;;  %v698_v30 = vld [vmem:[#allocation5 + $0x18] sm:$0xff]   ;;  %s653_s0 = smov [#allocation10]  }
  0x1e   :  { %v676_v3 = vshrl.u32 %v69_v0, 7  ;;  %v65_v8 = vcombine.high %v63_v7, %v63_v7  ;;  %vm45_vm0 = vcmask 261120   ;;  %v535_v23 = vunpack.c.h.bf16 %v684_v11  ;;  %s518_s1 = sshll.u32 %s653_s0, 4  ;;  %s519_s1 = int_to_ptr.vmem [resolvable:$true] %s518_s1 }
  0x1f   :  { %v68_v4 = vunpack.c.0.s8 %v67_v2  ;;  %v538_v24 = vunpack.c.l.bf16 %v687_v15  ;;  %v539_v32 = vunpack.c.h.bf16 %v687_v15  ;;  %v542_v41 = vunpack.c.l.bf16 %v698_v30  ;;  %s619_s21 = scalar_lea.vmem %s519_s1, 128  ;;  %p624_p11 = scmp.lt.s32.totalorder %s519_s1, %s519_s1 }
  0x20   :  { %v682_v10 = vsub.s32 0, %v676_v3  ;;  %v543_v49 = vunpack.c.h.bf16 %v698_v30  ;;  %vm42_vm1 = vcmask 7168   ;;  %v650_v57 = vmov -inf   ;;  %p620_p10 = scmp.ne.s32.totalorder %s519_s1, %s619_s21  ;;  %p625_p12 = scmp.lt.s32.totalorder %s619_s21, %s619_s21 }
  0x21   :  { %v71_v5 = vsub.s32 %v68_v4, %v676_v3  ;;  %43 = vst.msk [vmem:[#allocation2] sm:$0xff] %vm42_vm1, %v650_v57  ;;  %v197_v58 = vand.u32 127, %v69_v0  ;;  %vm230_vm2 = vcmask 1041409   ;;  %vm232_vm3 = vcmask 1042434  }
  0x22   :  { %vm234_vm4 = vcmask 1043459   ;;  %vm236_vm5 = vcmask 1044484   ;;  %vm238_vm6 = vcmask 1045509   ;;  %vm240_vm7 = vcmask 1046534   ;;  %p626_p13 = por %p625_p12, %p624_p11 }
  0x23   :  { %v72_v9 = vrot.slane %v63_v7, %v71_v5  ;;  %v79_v16 = vrot.slane %v65_v8, %v71_v5  ;;  %v733_v60 = vsub.s32 %v197_v58, %v676_v3  ;;  %vm242_vm8 = vcmask 1047559  }
  0x24   :  { %vm245_vm9 = vcmask 64512   ;;  %p627_p0 = pnand %p626_p13, %p620_p10 }
  0x25   :  { %v88_v13 = vrot.slane %v72_v9, %v71_v5  ;;  %v80_v14 = vcombine.high %v72_v9, %v72_v9  ;;  %v95_v22 = vrot.slane %v79_v16, %v71_v5  ;;  %v81_v25 = vcombine.high %v79_v16, %v79_v16 }
  0x27   :  { %v117_v19 = vrot.slane %v88_v13, %v682_v10  ;;  %v110_v20 = vcombine.high %v88_v13, %v88_v13  ;;  %v102_v21 = vrot.slane %v80_v14, %v71_v5  ;;  %v133_v31 = vrot.slane %v95_v22, %v682_v10 }
  0x28   :  { %v109_v33 = vrot.slane %v81_v25, %v71_v5  ;;  %v111_v34 = vcombine.high %v95_v22, %v95_v22 }
  0x29   :  { %v154_v26 = vmul.f32 %v530_v12, %v117_v19  ;;  %v125_v27 = vrot.slane %v110_v20, %v682_v10  ;;  %v121_v28 = vrot.slane %v102_v21, %v682_v10  ;;  %v112_v29 = vcombine.high %v102_v21, %v102_v21 }
  0x2a   :  { %v158_v39 = vmul.f32 %v538_v24, %v133_v31  ;;  %v137_v40 = vrot.slane %v109_v33, %v682_v10  ;;  %v113_v42 = vcombine.high %v109_v33, %v109_v33  ;;  %v141_v46 = vrot.slane %v111_v34, %v682_v10  ;;  %v762_v34 = vld [vmem:[#allocation2] sm:$0xff] }
  0x2b   :  { %v163_v35 = vsel %vm45_vm0, %v154_v26, 0.0  ;;  %v156_v36 = vmul.f32 %v534_v17, %v125_v27  ;;  %v155_v37 = vmul.f32 %v531_v18, %v121_v28  ;;  %v129_v38 = vrot.slane %v112_v29, %v682_v10 }
  0x2c   :  { %164 = vadd.xlane.f32.xlu0 %v163_v35  ;;  %v159_v48 = vmul.f32 %v539_v32, %v137_v40  ;;  %v145_v50 = vrot.slane %v113_v42, %v682_v10  ;;  %v175_v51 = vsel %vm45_vm0, %v158_v39, 0.0  ;;  %v160_v52 = vmul.f32 %v542_v41, %v141_v46 }
  0x2d   :  { %v169_v43 = vsel %vm45_vm0, %v156_v36, 0.0  ;;  %v166_v44 = vsel %vm45_vm0, %v155_v37, 0.0  ;;  %v157_v45 = vmul.f32 %v535_v23, %v129_v38  ;;  %v651_v31 = vmov 0  }
  0x2e   :  { %170 = vadd.xlane.f32.xlu1 %v169_v43  ;;  %v178_v53 = vsel %vm45_vm0, %v159_v48, 0.0  ;;  %v161_v54 = vmul.f32 %v543_v49, %v145_v50  ;;  %v181_v55 = vsel %vm45_vm0, %v160_v52, 0.0  ;;  %557 = vset.pattern.permute.xlu0 %v651_v31  ;;  %v652_v33 = vmov 0.0  }
  0x2f   :  { %v172_v47 = vsel %vm45_vm0, %v157_v45, 0.0  ;;  %556 = vset.pattern.permute.xlu1 %v651_v31  ;;  %44 = vst.msk [vmem:[#allocation3] sm:$0xff] %vm42_vm1, %v652_v33  ;;  %v263_v38 = vsub.s32 1, %v676_v3  ;;  %v267_v39 = vsub.s32 2, %v676_v3  ;;  %v271_v40 = vsub.s32 3, %v676_v3 }
  0x30   :  { %167 = vadd.xlane.f32.xlu0 %v166_v44  ;;  %v184_v56 = vsel %vm45_vm0, %v161_v54, 0.0  ;;  %46 = vst.msk [vmem:[#allocation4] sm:$0xff] %vm45_vm0, %v652_v33  ;;  %v275_v48 = vsub.s32 4, %v676_v3  ;;  %v279_v54 = vsub.s32 5, %v676_v3 }
  0x32   :  { %173 = vadd.xlane.f32.xlu1 %v172_v47 }
  0x34   :  { %176 = vadd.xlane.f32.xlu0 %v175_v51 }
  0x36   :  { %179 = vadd.xlane.f32.xlu1 %v178_v53 }
  0x38   :  { %182 = vadd.xlane.f32.xlu0 %v181_v55 }
  0x3a   :  { %185 = vadd.xlane.f32.xlu1 %v184_v56 }
  0xb5   :  { %v165_v59 = vpop.xlane.xlu0 %164 }
  0xb6   :  { %v201_v63 = vrot.slane %v165_v59, %v733_v60 }
  0xb7   :  { %v735_v61 = vpop.xlane.xlu1 %170 }
  0xb8   :  { %v209_v2 = vrot.slane %v735_v61, %v733_v60 }
  0xb9   :  { %v168_v62 = vpop.xlane.xlu0 %167 }
  0xba   :  { %v205_v1 = vrot.slane %v168_v62, %v733_v60 }
  0xbb   :  { %v174_v4 = vpop.xlane.xlu1 %173 }
  0xbc   :  { %v231_v0 = vsel %vm230_vm2, %v205_v1, %v201_v63  ;;  %v213_v5 = vrot.slane %v174_v4, %v733_v60 }
  0xbd   :  { %v233_v7 = vsel %vm232_vm3, %v209_v2, %v231_v0  ;;  %v177_v8 = vpop.xlane.xlu0 %176 }
  0xbe   :  { %v235_v9 = vsel %vm234_vm4, %v213_v5, %v233_v7  ;;  %v217_v13 = vrot.slane %v177_v8, %v733_v60 }
  0xbf   :  { %v180_v14 = vpop.xlane.xlu1 %179 }
  0xc0   :  { %v237_v16 = vsel %vm236_vm5, %v217_v13, %v235_v9  ;;  %v221_v19 = vrot.slane %v180_v14, %v733_v60 }
  0xc1   :  { %v748_v20 = vpop.xlane.xlu0 %182 }
  0xc2   :  { %v225_v21 = vrot.slane %v748_v20, %v733_v60  ;;  %v239_v22 = vsel %vm238_vm6, %v221_v19, %v237_v16 }
  0xc3   :  { %v753_v25 = vpop.xlane.xlu1 %185 }
  0xc4   :  { %v229_v26 = vrot.slane %v753_v25, %v733_v60  ;;  %v241_v27 = vsel %vm240_vm7, %v225_v21, %v239_v22 }
  0xc6   :  { %v243_v28 = vsel %vm242_vm8, %v229_v26, %v241_v27 }
  0xc7   :  { %v246_v29 = vsel %vm245_vm9, %v243_v28, -inf }
  0xc8   :  { %247 = vmax.xlane.f32.xlu0 %v246_v29 }
 0x151   :  { %v248_v35 = vpop.xlane.xlu0 %247 }
 0x152   :  { %v765_v36 = vmax.f32 %v762_v34, %v248_v35 }
 0x154   :  { %v250_v37 = vsub.f32 %v762_v34, %v765_v36  ;;  %498 = vst.msk [vmem:[#allocation2] sm:$0xff] %vm42_vm1, %v765_v36  ;;  %255 = vperm.xlu1 %556, %v765_v36  }
 0x1cf   :  { %v256_v42 = vpop.permute.xlu1 %255 }
 0x1d0   :  { %v260_v43 = vrot.slane %v256_v42, %v682_v10  ;;  %v264_v44 = vrot.slane %v256_v42, %v263_v38  ;;  %v268_v45 = vrot.slane %v256_v42, %v267_v39  ;;  %v272_v50 = vrot.slane %v256_v42, %v271_v40 }
 0x1d1   :  { %v276_v55 = vrot.slane %v256_v42, %v275_v48  ;;  %v283_v10 = vsub.s32 6, %v676_v3  ;;  %v280_v58 = vrot.slane %v256_v42, %v279_v54 }
 0x1d2   :  { %v297_v46 = vsub.f32 %v165_v59, %v260_v43  ;;  %v298_v47 = vsub.f32 %v168_v62, %v264_v44  ;;  %v299_v51 = vsub.f32 %v735_v61, %v268_v45  ;;  %v300_v56 = vsub.f32 %v174_v4, %v272_v50 }
 0x1d3   :  { %v301_v63 = vsub.f32 %v177_v8, %v276_v55  ;;  %v287_v62 = vsub.s32 7, %v676_v3  ;;  %v284_v1 = vrot.slane %v256_v42, %v283_v10  ;;  %v302_v2 = vsub.f32 %v180_v14, %v280_v58 }
 0x1d4   :  { %v305_v52 = vmul.f32 1.442695, %v297_v46  ;;  %v307_v53 = vmul.f32 1.442695, %v298_v47  ;;  %v309_v57 = vmul.f32 1.442695, %v299_v51 }
 0x1d5   :  { %v311_v59 = vmul.f32 1.442695, %v300_v56  ;;  %v313_v61 = vmul.f32 1.442695, %v301_v63  ;;  %v288_v5 = vrot.slane %v256_v42, %v287_v62  ;;  %v303_v7 = vsub.f32 %v748_v20, %v284_v1 }
 0x1d6   :  { %559 = vpow2.f32 %v305_v52  ;;  %v315_v4 = vmul.f32 1.442695, %v302_v2 }
 0x1d7   :  { %561 = vpow2.f32 %v307_v53  ;;  %v304_v13 = vsub.f32 %v753_v25, %v288_v5  ;;  %v317_v8 = vmul.f32 1.442695, %v303_v7 }
 0x1d8   :  { %563 = vpow2.f32 %v309_v57 }
 0x1d9   :  { %565 = vpow2.f32 %v311_v59  ;;  %v319_v3 = vmul.f32 1.442695, %v304_v13 }
 0x1da   :  { %567 = vpow2.f32 %v313_v61 }
 0x1db   :  { %569 = vpow2.f32 %v315_v4 }
 0x1dc   :  { %571 = vpow2.f32 %v317_v8 }
 0x1dd   :  { %573 = vpow2.f32 %v319_v3 }
 0x1e3   :  { %v560_v0 = vpop.eup %559 }
 0x1e4   :  { %v562_v9 = vpop.eup %561  ;;  %332 = vperm.xlu0 %557, %v560_v0  }
 0x1e5   :  { %335 = vperm.xlu1 %556, %v562_v9   ;;  %v564_v16 = vpop.eup %563 }
 0x1e6   :  { %v566_v14 = vpop.eup %565 }
 0x1e7   :  { %v568_v19 = vpop.eup %567 }
 0x1e8   :  { %v570_v21 = vpop.eup %569 }
 0x1e9   :  { %338 = vperm.xlu1 %556, %v564_v16   ;;  %v572_v20 = vpop.eup %571 }
 0x1ea   :  { %v574_v22 = vpop.eup %573 }
 0x1ed   :  { %341 = vperm.xlu1 %556, %v566_v14  }
 0x1f1   :  { %344 = vperm.xlu1 %556, %v568_v19  }
 0x1f5   :  { %347 = vperm.xlu1 %556, %v570_v21  }
 0x1f9   :  { %350 = vperm.xlu1 %556, %v572_v20  }
 0x1fd   :  { %353 = vperm.xlu1 %556, %v574_v22  }
 0x25f   :  { %v333_v26 = vpop.permute.xlu0 %332 }
 0x260   :  { %v336_v27 = vpop.permute.xlu1 %335  ;;  %v416_v25 = vmul.f32 %v530_v12, %v333_v26  ;;  %v358_v57 = vrot.slane %v333_v26, %v733_v60 }
 0x261   :  { %v417_v28 = vmul.f32 %v531_v18, %v336_v27  ;;  %v362_v56 = vrot.slane %v336_v27, %v733_v60 }
 0x262   :  { %v424_v29 = vsel %vm45_vm0, %v416_v25, 0.0 }
 0x263   :  { %v431_v31 = vsel %vm45_vm0, %v417_v28, 0.0  ;;  %v425_v33 = vrot.slane %v424_v29, 4  ;;  %v387_v5 = vsel %vm230_vm2, %v362_v56, %v358_v57  ;;  %v321_v57 = vld [vmem:[#allocation3] sm:$0xff] }
 0x264   :  { %v432_v35 = vrot.slane %v431_v31, 4  ;;  %v339_v38 = vpop.permute.xlu1 %338 }
 0x265   :  { %v426_v39 = vadd.f32 %v425_v33, %v424_v29  ;;  %v418_v40 = vmul.f32 %v534_v17, %v339_v38  ;;  %v366_v63 = vrot.slane %v339_v38, %v733_v60 }
 0x266   :  { %v433_v42 = vadd.f32 %v432_v35, %v431_v31 }
 0x267   :  { %v427_v43 = vrot.slane %v426_v39, 2  ;;  %v438_v44 = vsel %vm45_vm0, %v418_v40, 0.0  ;;  %v388_v8 = vsel %vm232_vm3, %v366_v63, %v387_v5 }
 0x268   :  { %v434_v45 = vrot.slane %v433_v42, 2  ;;  %v439_v12 = vrot.slane %v438_v44, 4  ;;  %v342_v46 = vpop.permute.xlu1 %341 }
 0x269   :  { %v428_v6 = vadd.f32 %v427_v43, %v426_v39  ;;  %v419_v18 = vmul.f32 %v535_v23, %v342_v46  ;;  %v370_v0 = vrot.slane %v342_v46, %v733_v60 }
 0x26a   :  { %v435_v47 = vadd.f32 %v434_v45, %v433_v42  ;;  %v440_v48 = vadd.f32 %v439_v12, %v438_v44 }
 0x26b   :  { %v429_v50 = vrot.slane %v428_v6, 1  ;;  %v445_v51 = vsel %vm45_vm0, %v419_v18, 0.0 }
 0x26c   :  { %v436_v52 = vrot.slane %v435_v47, 1  ;;  %v441_v53 = vrot.slane %v440_v48, 2  ;;  %v446_v54 = vrot.slane %v445_v51, 4  ;;  %v345_v17 = vpop.permute.xlu1 %344 }
 0x26d   :  { %v420_v55 = vmul.f32 %v538_v24, %v345_v17  ;;  %v430_v23 = vadd.f32 %v429_v50, %v428_v6  ;;  %v374_v16 = vrot.slane %v345_v17, %v733_v60 }
 0x26e   :  { %v442_v10 = vadd.f32 %v441_v53, %v440_v48  ;;  %v447_v58 = vadd.f32 %v446_v54, %v445_v51  ;;  %v437_v11 = vadd.f32 %v436_v52, %v435_v47 }
 0x26f   :  { %v452_v59 = vsel %vm45_vm0, %v420_v55, 0.0  ;;  %v251_v55 = vmul.f32 1.442695, %v250_v37 }
 0x270   :  { %v443_v62 = vrot.slane %v442_v10, 1  ;;  %v448_v1 = vrot.slane %v447_v58, 2  ;;  %v453_v2 = vrot.slane %v452_v59, 4  ;;  %v348_v61 = vpop.permute.xlu1 %347  ;;  %v488_v13 = vsel %vm230_vm2, %v437_v11, %v430_v23 }
 0x271   :  { %v421_v24 = vmul.f32 %v539_v32, %v348_v61  ;;  %v389_v32 = vsel %vm234_vm4, %v370_v0, %v388_v8  ;;  %v378_v22 = vrot.slane %v348_v61, %v733_v60  ;;  %575 = vpow2.f32 %v251_v55  ;;  %v401_v61 = vld [vmem:[#allocation4] sm:$0xff] }
 0x272   :  { %v444_v7 = vadd.f32 %v443_v62, %v442_v10  ;;  %v449_v4 = vadd.f32 %v448_v1, %v447_v58  ;;  %v454_v9 = vadd.f32 %v453_v2, %v452_v59  ;;  %v390_v31 = vsel %vm236_vm5, %v374_v16, %v389_v32 }
 0x273   :  { %v459_v3 = vsel %vm45_vm0, %v421_v24, 0.0  ;;  %v391_v44 = vsel %vm238_vm6, %v378_v22, %v390_v31 }
 0x274   :  { %v489_v14 = vsel %vm232_vm3, %v444_v7, %v488_v13  ;;  %v450_v19 = vrot.slane %v449_v4, 1  ;;  %v455_v21 = vrot.slane %v454_v9, 2  ;;  %v460_v20 = vrot.slane %v459_v3, 4  ;;  %v351_v15 = vpop.permute.xlu1 %350 }
 0x275   :  { %v422_v26 = vmul.f32 %v542_v41, %v351_v15  ;;  %v382_v29 = vrot.slane %v351_v15, %v733_v60 }
 0x276   :  { %v451_v27 = vadd.f32 %v450_v19, %v449_v4  ;;  %v456_v25 = vadd.f32 %v455_v21, %v454_v9  ;;  %v461_v28 = vadd.f32 %v460_v20, %v459_v3 }
 0x277   :  { %v466_v33 = vsel %vm45_vm0, %v422_v26, 0.0  ;;  %v392_v46 = vsel %vm240_vm7, %v382_v29, %v391_v44 }
 0x278   :  { %v457_v35 = vrot.slane %v456_v25, 1  ;;  %v462_v38 = vrot.slane %v461_v28, 2  ;;  %v467_v39 = vrot.slane %v466_v33, 4  ;;  %v354_v40 = vpop.permute.xlu1 %353  ;;  %v490_v42 = vsel %vm234_vm4, %v451_v27, %v489_v14 }
 0x279   :  { %v386_v43 = vrot.slane %v354_v40, %v733_v60  ;;  %v423_v63 = vmul.f32 %v543_v49, %v354_v40 }
 0x27a   :  { %v458_v41 = vadd.f32 %v457_v35, %v456_v25  ;;  %v463_v45 = vadd.f32 %v462_v38, %v461_v28  ;;  %v468_v12 = vadd.f32 %v467_v39, %v466_v33 }
 0x27b   :  { %v393_v6 = vsel %vm242_vm8, %v386_v43, %v392_v46  ;;  %v473_v59 = vsel %vm45_vm0, %v423_v63, 0.0 }
 0x27c   :  { %v464_v18 = vrot.slane %v463_v45, 1  ;;  %v469_v47 = vrot.slane %v468_v12, 2  ;;  %v395_v48 = vsel %vm245_vm9, %v393_v6, 0.0  ;;  %v491_v50 = vsel %vm236_vm5, %v458_v41, %v490_v42 }
 0x27d   :  { %396 = vadd.xlane.f32.xlu1 %v395_v48  ;;  %v474_v62 = vrot.slane %v473_v59, 4 }
 0x27e   :  { %v465_v51 = vadd.f32 %v464_v18, %v463_v45  ;;  %v470_v52 = vadd.f32 %v469_v47, %v468_v12  ;;  %v576_v56 = vpop.eup %575 }
 0x27f   :  { %v322_v10 = vmul.f32 %v576_v56, %v321_v57  ;;  %v475_v1 = vadd.f32 %v474_v62, %v473_v59 }
 0x280   :  { %v471_v53 = vrot.slane %v470_v52, 1  ;;  %v492_v60 = vsel %vm238_vm6, %v465_v51, %v491_v50 }
 0x281   :  { %v476_v34 = vrot.slane %v475_v1, 2 }
 0x282   :  { %v472_v54 = vadd.f32 %v471_v53, %v470_v52 }
 0x283   :  { %v477_v36 = vadd.f32 %v476_v34, %v475_v1 }
 0x284   :  { %v493_v17 = vsel %vm240_vm7, %v472_v54, %v492_v60 }
 0x285   :  { %v478_v37 = vrot.slane %v477_v36, 1 }
 0x287   :  { %v479_v0 = vadd.f32 %v478_v37, %v477_v36 }
 0x289   :  { %v494_v7 = vsel %vm242_vm8, %v479_v0, %v493_v17 }
 0x306   :  { %v397_v58 = vpop.xlane.xlu1 %396 }
 0x307   :  { %v398_v11 = vadd.f32 %v397_v58, %v322_v10 }
 0x309   :  { %400 = vst.msk [vmem:[#allocation3] sm:$0xff] %vm42_vm1, %v398_v11 }
 0x310   :  { %v503_v23 = vld [vmem:[#allocation3] sm:$0xff] }
 0x311   :  { %506 = vperm.xlu0 %557, %v503_v23  }
 0x315   :  { %404 = vperm.xlu0 %557, %v576_v56  }
 0x38c   :  { %v507_v2 = vpop.permute.xlu0 %506 }
 0x38d   :  { %577 = vrcp.f32 %v507_v2 }
 0x390   :  { %v405_v24 = vpop.permute.xlu0 %404 }
 0x391   :  { %v407_v5 = vmul.f32 %v405_v24, %v401_v61 }
 0x393   :  { %v496_v4 = vadd.f32 %v494_v7, %v407_v5 }
 0x395   :  { %497 = vst.msk [vmem:[#allocation4] sm:$0xff] %vm45_vm0, %v496_v4 }
 0x39a   :  { %v578_v30 = vpop.eup %577 }
 0x39c   :  { %v502_v49 = vld [vmem:[#allocation4] sm:$0xff] }
 0x39d   :  { %v510_v9 = vmul.f32 %v578_v30, %v502_v49 }
 0x39f   :  { %511 = vst.msk [vmem:[#allocation10] sm:$0xff] %vm45_vm0, %v510_v9 }
 0x3a0   :  { %630 = shalt.err (!%p627_p0)
}
 0x3a1   :  { %521 = dma.vmem_to_hbm [thread:$0]  %s519_s1, 128, %s841_s2, [#allocation7]  }
 0x3a2   :  { %643 = dma.done.wait [#allocation7], 128  }
 0x3a3   :  { %644 = vsyncadd [#allocation7], 4294967168 }
 0x3a4   :  { %525 = vsyncpa [#allocation6], 1 }
 0x3a5   :  { %526 = vsyncpa [#allocation9], 1 }
 0x3a6   :  { %527 = vsyncpa [#allocation7], 1 }

</bundles_post_ra>
